<compile_context>
chip_gen: v5e
topology: v5e:2x2
jax: 0.10.0
libtpu: 0.0.40
codegen_flags: <defaults>
</compile_context>

<pallas_src>
import jax
import jax.numpy as jnp
from jax import lax
from jax.experimental import pallas as pl
from jax.experimental.pallas import tpu as pltpu


def _leaky_relu(x, negative_slope=0.01):
    # PyTorch nn.LeakyReLU default negative_slope = 0.01
    return jnp.where(x > 0, x, negative_slope * x)


def mlp_kernel(x_ref, w1_ref, b1_ref, w2_ref, b2_ref, w3_ref, b3_ref, o_ref):
    # One fused grid step, everything feature-major (batch on the lane axis).
    x = x_ref[...]                                                  # (TB, D)
    # h1t = w1.T @ x.T : contract D (w1 dim 0 with x dim 1) -> (20, TB)
    h1 = lax.dot_general(w1_ref[...], x, (((0,), (1,)), ((), ())),
                         preferred_element_type=jnp.float32)
    h1 = _leaky_relu(h1 + b1_ref[...])                              # b1: (20, 1)
    # h2t = w2.T @ h1t : contract 20 -> (16, TB)
    h2 = lax.dot_general(w2_ref[...], h1, (((0,), (0,)), ((), ())),
                         preferred_element_type=jnp.float32)
    h2 = _leaky_relu(h2 + b2_ref[...])                              # b2: (16, 1)
    # y = w3 @ h2t : contract 16 -> (1, TB), lane-dense output block.
    y = lax.dot_general(w3_ref[...], h2, (((1,), (0,)), ((), ())),
                        preferred_element_type=jnp.float32)
    o_ref[...] = (y + b3_ref[...]).astype(o_ref.dtype)


def _round_up(n, m):
    return ((n + m - 1) // m) * m


def regression_model_forward(x, params, tile_max=8192):
    """x: (B, input_size) f32 -> (B, 1) f32 (matches the nn.Linear chain)."""
    w1, b1, w2, b2, w3, b3 = params
    B, D = x.shape

    # Feature-major biases for the transposed kernel (tiny reshapes).
    b1_t = b1.reshape(-1, 1)   # (20, 1)
    b2_t = b2.reshape(-1, 1)   # (16, 1)
    b3_t = b3.reshape(1, 1)    # (1, 1)

    # Padding-aware large tile: balance B across ceil(B / tile_max) steps,
    # rounded to a multiple of 256 (fills MXU M-dim, caps padding waste).
    num_steps = max(1, pl.cdiv(B, tile_max))
    tile_b = _round_up(pl.cdiv(B, num_steps), 256)
    padded_b = _round_up(B, tile_b)
    if padded_b != B:
        x = jnp.pad(x, ((0, padded_b - B), (0, 0)))
    num_tiles = padded_b // tile_b

    const = lambda i: (0, 0)  # weights/biases: same block every step -> VMEM-resident

    flops = 2 * padded_b * (D * 20 + 20 * 16 + 16 * 1)
    bytes_accessed = (padded_b * D + padded_b          # x in, y out
                      + w1.size + w2.size + w3.size
                      + b1.size + b2.size + b3.size) * 4

    out_t = pl.pallas_call(
        mlp_kernel,
        out_shape=jax.ShapeDtypeStruct((1, padded_b), jnp.float32),
        grid=(num_tiles,),
        in_specs=[
            pl.BlockSpec((tile_b, D), lambda i: (i, 0)),   # x streams over the batch
            pl.BlockSpec(w1.shape, const),
            pl.BlockSpec(b1_t.shape, const),
            pl.BlockSpec(w2.shape, const),
            pl.BlockSpec(b2_t.shape, const),
            pl.BlockSpec(w3.shape, const),
            pl.BlockSpec(b3_t.shape, const),
        ],
        # Lane-dense output slab: (1, padded_B), batch on lanes.
        out_specs=pl.BlockSpec((1, tile_b), lambda i: (0, i)),
        compiler_params=pltpu.CompilerParams(
            dimension_semantics=("parallel",),
            vmem_limit_bytes=32 * 1024 * 1024,
        ),
        cost_estimate=pl.CostEstimate(flops=flops, transcendentals=0,
                                      bytes_accessed=bytes_accessed),
    )(x, w1, b1_t, w2, b2_t, w3, b3_t)
    return out_t[0, :B][:, None]  # back to (B, 1)


def init_params(key, input_size):
    # Deterministic uniform init, like PyTorch's default nn.Linear init.
    def linear_init(k, fan_in, w_shape, b_shape):
        k_w, k_b = jax.random.split(k)
        bound = 1.0 / jnp.sqrt(fan_in)
        w = jax.random.uniform(k_w, w_shape, jnp.float32, -bound, bound)
        b = jax.random.uniform(k_b, b_shape, jnp.float32, -bound, bound)
        return w, b

    k1, k2, k3 = jax.random.split(key, 3)
    w1, b1 = linear_init(k1, input_size, (input_size, 20), (1, 20))  # fc1.weight.T
    w2, b2 = linear_init(k2, 20, (20, 16), (1, 16))                  # fc2.weight.T
    w3, b3 = linear_init(k3, 16, (1, 16), (1, 1))                    # fc3.weight
    return (w1, b1, w2, b2, w3, b3)


def reference_forward(x, params):
    w1, b1, w2, b2, w3, b3 = params
    h = _leaky_relu(x @ w1 + b1)
    h = _leaky_relu(h @ w2 + b2)
    return h @ w3.T + b3


if __name__ == "__main__":
    key = jax.random.PRNGKey(0)
    k_x, k_x2, k_p = jax.random.split(key, 3)

    batch, input_size = 8, 32
    params = init_params(k_p, input_size)

    # Small-batch check (single tile, padded to 256 rows).
    x = jax.random.normal(k_x, (batch, input_size), jnp.float32)
    out = jax.block_until_ready(regression_model_forward(x, params))
    ref = reference_forward(x, params)
    assert out.shape == (batch, 1)
    assert jnp.allclose(out, ref, atol=1e-5, rtol=1e-5)

    # Multi-tile check (exercises padding-aware tiling, batch grid, parallel axis).
    big_batch = 10000   # -> 2 balanced tiles of 5120 rows, 240 rows of padding
    x_big = jax.random.normal(k_x2, (big_batch, input_size), jnp.float32)
    out_big = jax.block_until_ready(regression_model_forward(x_big, params))
    ref_big = reference_forward(x_big, params)
    assert out_big.shape == (big_batch, 1)
    assert jnp.allclose(out_big, ref_big, atol=1e-4, rtol=1e-5)

    print("KERNEL_OK")
</pallas_src>

<mosaic_0001>
module attributes {stable_mosaic.version = 11 : i64} {
  func.func @mlp_kernel(%arg0: i32, %arg1: memref<256x32xf32, #tpu.memory_space<vmem>>, %arg2: memref<32x20xf32, #tpu.memory_space<vmem>>, %arg3: memref<20x1xf32, #tpu.memory_space<vmem>>, %arg4: memref<20x16xf32, #tpu.memory_space<vmem>>, %arg5: memref<16x1xf32, #tpu.memory_space<vmem>>, %arg6: memref<1x16xf32, #tpu.memory_space<vmem>>, %arg7: memref<1x1xf32, #tpu.memory_space<vmem>>, %arg8: memref<1x256xf32, #tpu.memory_space<vmem>>) attributes {dimension_semantics = [#tpu.dimension_semantics<parallel>], iteration_bounds = array<i64: 1>, scalar_prefetch = 0 : i64, scratch_operands = 0 : i64, tpu.core_type = #tpu.core_type<tc>, window_params = [{transform_indices = @transform_0, window_bounds = array<i64: 256, 32>}, {pipeline_mode = #tpu.pipeline_mode<synchronous>, transform_indices = @transform_1, window_bounds = array<i64: 32, 20>}, {pipeline_mode = #tpu.pipeline_mode<synchronous>, transform_indices = @transform_2, window_bounds = array<i64: 20, 1>}, {pipeline_mode = #tpu.pipeline_mode<synchronous>, transform_indices = @transform_3, window_bounds = array<i64: 20, 16>}, {pipeline_mode = #tpu.pipeline_mode<synchronous>, transform_indices = @transform_4, window_bounds = array<i64: 16, 1>}, {pipeline_mode = #tpu.pipeline_mode<synchronous>, transform_indices = @transform_5, window_bounds = array<i64: 1, 16>}, {pipeline_mode = #tpu.pipeline_mode<synchronous>, transform_indices = @transform_6, window_bounds = array<i64: 1, 1>}, {transform_indices = @transform_7, window_bounds = array<i64: 1, 256>}]} {
    %c0 = arith.constant 0 : index
    %c0_0 = arith.constant 0 : index
    %0 = vector.load %arg1[%c0, %c0_0] : memref<256x32xf32, #tpu.memory_space<vmem>>, vector<256x32xf32>
    %c0_1 = arith.constant 0 : index
    %c0_2 = arith.constant 0 : index
    %1 = vector.load %arg2[%c0_1, %c0_2] : memref<32x20xf32, #tpu.memory_space<vmem>>, vector<32x20xf32>
    %cst = arith.constant dense<0.000000e+00> : vector<20x256xf32>
    %2 = tpu.matmul %1, %0, %cst {dimension_numbers = #tpu.dot_dimension_numbers<[0], [1], [1], [0], [0, 1, 1, 0], [], []>} : vector<32x20xf32>, vector<256x32xf32>, vector<20x256xf32> -> vector<20x256xf32>
    %c0_3 = arith.constant 0 : index
    %c0_4 = arith.constant 0 : index
    %3 = vector.load %arg3[%c0_3, %c0_4] : memref<20x1xf32, #tpu.memory_space<vmem>>, vector<20x1xf32>
    %4 = vector.broadcast %3 : vector<20x1xf32> to vector<20x256xf32>
    %5 = arith.addf %2, %4 : vector<20x256xf32>
    %cst_5 = arith.constant 0.000000e+00 : f32
    %6 = vector.broadcast %cst_5 : f32 to vector<20x256xf32>
    %7 = arith.cmpf ogt, %5, %6 : vector<20x256xf32>
    %cst_6 = arith.constant 0.00999999977 : f32
    %8 = vector.broadcast %cst_6 : f32 to vector<20x256xf32>
    %9 = arith.mulf %8, %5 : vector<20x256xf32>
    %10 = arith.select %7, %5, %9 : vector<20x256xi1>, vector<20x256xf32>
    %c0_7 = arith.constant 0 : index
    %c0_8 = arith.constant 0 : index
    %11 = vector.load %arg4[%c0_7, %c0_8] : memref<20x16xf32, #tpu.memory_space<vmem>>, vector<20x16xf32>
    %cst_9 = arith.constant dense<0.000000e+00> : vector<16x256xf32>
    %12 = tpu.matmul %11, %10, %cst_9 {dimension_numbers = #tpu.dot_dimension_numbers<[0], [0], [1], [1], [0, 1, 1, 1], [], []>} : vector<20x16xf32>, vector<20x256xf32>, vector<16x256xf32> -> vector<16x256xf32>
    %c0_10 = arith.constant 0 : index
    %c0_11 = arith.constant 0 : index
    %13 = vector.load %arg5[%c0_10, %c0_11] : memref<16x1xf32, #tpu.memory_space<vmem>>, vector<16x1xf32>
    %14 = vector.broadcast %13 : vector<16x1xf32> to vector<16x256xf32>
    %15 = arith.addf %12, %14 : vector<16x256xf32>
    %cst_12 = arith.constant 0.000000e+00 : f32
    %16 = vector.broadcast %cst_12 : f32 to vector<16x256xf32>
    %17 = arith.cmpf ogt, %15, %16 : vector<16x256xf32>
    %cst_13 = arith.constant 0.00999999977 : f32
    %18 = vector.broadcast %cst_13 : f32 to vector<16x256xf32>
    %19 = arith.mulf %18, %15 : vector<16x256xf32>
    %20 = arith.select %17, %15, %19 : vector<16x256xi1>, vector<16x256xf32>
    %c0_14 = arith.constant 0 : index
    %c0_15 = arith.constant 0 : index
    %21 = vector.load %arg6[%c0_14, %c0_15] : memref<1x16xf32, #tpu.memory_space<vmem>>, vector<1x16xf32>
    %cst_16 = arith.constant dense<0.000000e+00> : vector<1x256xf32>
    %22 = tpu.matmul %21, %20, %cst_16 {dimension_numbers = #tpu.dot_dimension_numbers<[1], [0], [0], [1], [0, 0, 1, 1], [], []>} : vector<1x16xf32>, vector<16x256xf32>, vector<1x256xf32> -> vector<1x256xf32>
    %c0_17 = arith.constant 0 : index
    %c0_18 = arith.constant 0 : index
    %23 = vector.load %arg7[%c0_17, %c0_18] : memref<1x1xf32, #tpu.memory_space<vmem>>, vector<1x1xf32>
    %24 = vector.broadcast %23 : vector<1x1xf32> to vector<1x256xf32>
    %25 = arith.addf %22, %24 : vector<1x256xf32>
    %c0_19 = arith.constant 0 : index
    %c0_20 = arith.constant 0 : index
    %26 = vector.load %arg8[%c0_19, %c0_20] : memref<1x256xf32, #tpu.memory_space<vmem>>, vector<1x256xf32>
    tpu.vector_store %arg8[%c0_19, %c0_20], %25 {strides = array<i32>} : memref<1x256xf32, #tpu.memory_space<vmem>>, vector<1x256xf32>,
    return
  }
  func.func @transform_0(%arg0: i32) -> (i32, i32) {
    %c0_i32 = arith.constant 0 : i32
    %c0_i32_0 = arith.constant 0 : i32
    return %arg0, %c0_i32 : i32, i32
  }
  func.func @transform_1(%arg0: i32) -> (i32, i32) {
    %c0_i32 = arith.constant 0 : i32
    %c0_i32_0 = arith.constant 0 : i32
    %c0_i32_1 = arith.constant 0 : i32
    return %c0_i32, %c0_i32_0 : i32, i32
  }
  func.func @transform_2(%arg0: i32) -> (i32, i32) {
    %c0_i32 = arith.constant 0 : i32
    %c0_i32_0 = arith.constant 0 : i32
    %c0_i32_1 = arith.constant 0 : i32
    return %c0_i32, %c0_i32_0 : i32, i32
  }
  func.func @transform_3(%arg0: i32) -> (i32, i32) {
    %c0_i32 = arith.constant 0 : i32
    %c0_i32_0 = arith.constant 0 : i32
    %c0_i32_1 = arith.constant 0 : i32
    return %c0_i32, %c0_i32_0 : i32, i32
  }
  func.func @transform_4(%arg0: i32) -> (i32, i32) {
    %c0_i32 = arith.constant 0 : i32
    %c0_i32_0 = arith.constant 0 : i32
    %c0_i32_1 = arith.constant 0 : i32
    return %c0_i32, %c0_i32_0 : i32, i32
  }
  func.func @transform_5(%arg0: i32) -> (i32, i32) {
    %c0_i32 = arith.constant 0 : i32
    %c0_i32_0 = arith.constant 0 : i32
    %c0_i32_1 = arith.constant 0 : i32
    return %c0_i32, %c0_i32_0 : i32, i32
  }
  func.func @transform_6(%arg0: i32) -> (i32, i32) {
    %c0_i32 = arith.constant 0 : i32
    %c0_i32_0 = arith.constant 0 : i32
    %c0_i32_1 = arith.constant 0 : i32
    return %c0_i32, %c0_i32_0 : i32, i32
  }
  func.func @transform_7(%arg0: i32) -> (i32, i32) {
    %c0_i32 = arith.constant 0 : i32
    %c0_i32_0 = arith.constant 0 : i32
    return %c0_i32, %arg0 : i32, i32
  }
}

</mosaic_0001>

<bundles_post_ra>
// kernel: tpu_custom_call.1
= control target key start
LH: loop header
LB: loop body
LE: loop exit
PB: predicated region body
PF: predicated region fallthrough
CT: control target
= control target key end

     0   :  { %s791_s0 = inlined_call_operand.vmem [shape: f32[256,32], index: 0, kind: input, shape index: {}]   ;;  %s792_s1 = inlined_call_operand.vmem [shape: f32[32,20], index: 1, kind: input, shape index: {}]   ;;  %s793_s2 = inlined_call_operand.vmem [shape: f32[20,1], index: 2, kind: input, shape index: {}]   ;;  %s794_s3 = inlined_call_operand.vmem [shape: f32[20,16], index: 3, kind: input, shape index: {}]   ;;  %s795_s4 = inlined_call_operand.vmem [shape: f32[16,1], index: 4, kind: input, shape index: {}]   ;;  %s796_s5 = inlined_call_operand.vmem [shape: f32[1,16], index: 5, kind: input, shape index: {}]   ;;  %s797_s6 = inlined_call_operand.<no memory space> [shape: f32[1,1], index: 6, kind: input, shape index: {}]   ;;  %s798_s7 = inlined_call_operand.hbm [shape: f32[1,256], index: 7, kind: output, shape index: {}]  }
   0x1   :  { %v12_v0 = vstv %s797_s6 }
   0x2   :  { %13 = vst [vmem:[#allocation2] sm:$0x1] %v12_v0 }
   0x3   :  { %v61_v1 = vld [vmem:[%s792_s1] sm:$0xff]  ;;  %vm115_vm0 = vcmask 261120   ;;  %v44_v2 = vld [vmem:[%s791_s0 + $0x78] sm:$0xff]  ;;  %v567_v4 = vmov 0   ;;  %v43_v5 = vld [vmem:[%s791_s0 + $0x70] sm:$0xff] }
   0x4   :  { %83 = vxpose.xlu0.b32.start [1/4] (short) (narrow) %v61_v1, 24  ;;  %v60_v3 = vld [vmem:[%s791_s0 + $0xf8] sm:$0xff]  ;;  %539 = vset.pattern.permute.xlu2 %v567_v4  ;;  %v59_v6 = vld [vmem:[%s791_s0 + $0xf0] sm:$0xff]  ;;  %v65_v7 = vld [vmem:[%s793_s2] sm:$0xff] }
   0x5   :  { %489 = vmatpush.xpose.msk.msra.mxu0 %vm115_vm0, %v44_v2  ;;  %508 = vmatpush.xpose.msk.msra.mxu1 %vm115_vm0, %v60_v3  ;;  %v62_v8 = vld [vmem:[%s792_s1 + $0x8] sm:$0xff] }
   0x6   :  { %538 = vset.pattern.permute.xlu1 %v567_v4  ;;  %v42_v9 = vld [vmem:[%s791_s0 + $0x68] sm:$0xff]  ;;  %70 = vperm.xlu2 %539, %v65_v7  }
   0x7   :  { %v58_v10 = vld [vmem:[%s791_s0 + $0xe8] sm:$0xff] }
   0x9   :  { %490 = vmatpush.xpose.msk.msra.mxu0 %vm115_vm0, %v43_v5  ;;  %509 = vmatpush.xpose.msk.msra.mxu1 %vm115_vm0, %v59_v6 }
   0xa   :  { %14 = vsyncpa [#allocation4], 0  ;;  %v41_v11 = vld [vmem:[%s791_s0 + $0x60] sm:$0xff]  ;;  %v63_v13 = vld [vmem:[%s792_s1 + $0x10] sm:$0xff]  ;;  %vm345_vm1 = vcmask 1043456   ;;  %vm338_vm8 = vcmask 162816  }
   0xb   :  { %v57_v12 = vld [vmem:[%s791_s0 + $0xe0] sm:$0xff]  ;;  %v40_v14 = vld [vmem:[%s791_s0 + $0x58] sm:$0xff]  ;;  %v39_v16 = vld [vmem:[%s791_s0 + $0x50] sm:$0xff]  ;;  %vm418_vm13 = vcmask 130048   ;;  %vm465_vm14 = vcmask 1040384  }
   0xc   :  { %84 = vxpose.xlu0.b32.cont [2/4] (short) (narrow) %v62_v8, 24  ;;  %v56_v15 = vld [vmem:[%s791_s0 + $0xd8] sm:$0xff]  ;;  %v55_v17 = vld [vmem:[%s791_s0 + $0xd0] sm:$0xff]  ;;  %v38_v19 = vld [vmem:[%s791_s0 + $0x48] sm:$0xff] }
   0xd   :  { %491 = vmatpush.xpose.msk.msra.mxu0 %vm115_vm0, %v42_v9  ;;  %510 = vmatpush.xpose.msk.msra.mxu1 %vm115_vm0, %v58_v10  ;;  %v64_v18 = vld [vmem:[%s792_s1 + $0x18] sm:$0xff]  ;;  %v54_v20 = vld [vmem:[%s791_s0 + $0xc8] sm:$0xff]  ;;  %v67_v21 = vld [vmem:[%s793_s2 + $0x10] sm:$0xf]  ;;  %s480_s1 = sshll.u32 %s798_s7, 4  ;;  %s481_s1 = int_to_ptr.hbm [resolvable:$true] %s480_s1 }
   0xe   :  { %v37_v22 = vld [vmem:[%s791_s0 + $0x40] sm:$0xff]  ;;  %80 = vperm.xlu1 %538, %v67_v21   ;;  %v36_v24 = vld [vmem:[%s791_s0 + $0x38] sm:$0xff]  ;;  %v35_v26 = vld [vmem:[%s791_s0 + $0x30] sm:$0xff] }
   0xf   :  { %v53_v23 = vld [vmem:[%s791_s0 + $0xc0] sm:$0xff]  ;;  %v52_v25 = vld [vmem:[%s791_s0 + $0xb8] sm:$0xff]  ;;  %v51_v27 = vld [vmem:[%s791_s0 + $0xb0] sm:$0xff] }
  0x10   :  { %v34_v28 = vld [vmem:[%s791_s0 + $0x28] sm:$0xff]  ;;  %v291_v30 = vld [vmem:[%s794_s3] sm:$0xff]  ;;  %v32_v33 = vld [vmem:[%s791_s0 + $0x18] sm:$0xff] }
  0x11   :  { %492 = vmatpush.xpose.msk.msra.mxu0 %vm115_vm0, %v41_v11  ;;  %511 = vmatpush.xpose.msk.msra.mxu1 %vm115_vm0, %v57_v12  ;;  %v50_v29 = vld [vmem:[%s791_s0 + $0xa8] sm:$0xff]  ;;  %v33_v31 = vld [vmem:[%s791_s0 + $0x20] sm:$0xff]  ;;  %v48_v34 = vld [vmem:[%s791_s0 + $0x98] sm:$0xff] }
  0x12   :  { %v49_v32 = vld [vmem:[%s791_s0 + $0xa0] sm:$0xff]  ;;  %v31_v35 = vld [vmem:[%s791_s0 + $0x10] sm:$0xff]  ;;  %v30_v37 = vld [vmem:[%s791_s0 + $0x8] sm:$0xff] }
  0x13   :  { %v47_v36 = vld [vmem:[%s791_s0 + $0x90] sm:$0xff]  ;;  %v46_v38 = vld [vmem:[%s791_s0 + $0x88] sm:$0xff]  ;;  %v29_v39 = vld [vmem:[%s791_s0] sm:$0xff] }
  0x14   :  { %85 = vxpose.xlu0.b32.cont [3/4] (short) (narrow) %v63_v13, 24  ;;  %v45_v40 = vld [vmem:[%s791_s0 + $0x80] sm:$0xff]  ;;  %v66_v41 = vld [vmem:[%s793_s2 + $0x8] sm:$0xff]  ;;  %v293_v44 = vld [vmem:[%s794_s3 + $0x10] sm:$0xf] }
  0x15   :  { %493 = vmatpush.xpose.msk.msra.mxu0 %vm115_vm0, %v40_v14  ;;  %512 = vmatpush.xpose.msk.msra.mxu1 %vm115_vm0, %v56_v15  ;;  %v292_v42 = vld [vmem:[%s794_s3 + $0x8] sm:$0xff]  ;;  %v294_v45 = vld [vmem:[%s795_s4] sm:$0xff] }
  0x16   :  { %75 = vperm.xlu1 %538, %v66_v41   ;;  %v295_v43 = vld [vmem:[%s795_s4 + $0x8] sm:$0xff]  ;;  %v411_v14 = vld [vmem:[#allocation2] sm:$0x1]  ;;  %s568_s4 = smov [#allocation3]  }
  0x17   :  { %s478_s15 = sshll.u32 %s568_s4, 4  ;;  %s479_s15 = int_to_ptr.vmem [resolvable:$true] %s478_s15 }
  0x19   :  { %494 = vmatpush.xpose.msk.msra.mxu0 %vm115_vm0, %v39_v16  ;;  %513 = vmatpush.xpose.msk.msra.mxu1 %vm115_vm0, %v55_v17 }
  0x1c   :  { %86 = vxpose.xlu0.b32.end [4/4] (short) (narrow) %v64_v18, 24 }
  0x1d   :  { %495 = vmatpush.xpose.msk.msra.mxu0 %vm115_vm0, %v38_v19  ;;  %514 = vmatpush.xpose.msk.msra.mxu1 %vm115_vm0, %v54_v20 }
  0x1e   :  { %303 = vperm.xlu1 %538, %v295_v43  }
  0x21   :  { %496 = vmatpush.xpose.msk.msra.mxu0 %vm115_vm0, %v37_v22  ;;  %515 = vmatpush.xpose.msk.msra.mxu1 %vm115_vm0, %v53_v23 }
  0x25   :  { %497 = vmatpush.xpose.msk.msra.mxu0 %vm115_vm0, %v36_v24  ;;  %516 = vmatpush.xpose.msk.msra.mxu1 %vm115_vm0, %v52_v25 }
  0x26   :  { %298 = vperm.xlu1 %538, %v294_v45  }
  0x29   :  { %498 = vmatpush.xpose.msk.msra.mxu0 %vm115_vm0, %v35_v26  ;;  %517 = vmatpush.xpose.msk.msra.mxu1 %vm115_vm0, %v51_v27 }
  0x2c   :  { %306 = vxpose.xlu2.b32.start [1/3] (short) (narrow) %v291_v30, 16 }
  0x2d   :  { %499 = vmatpush.xpose.msk.msra.mxu0 %vm115_vm0, %v34_v28  ;;  %518 = vmatpush.xpose.msk.msra.mxu1 %vm115_vm0, %v50_v29 }
  0x31   :  { %500 = vmatpush.xpose.msk.msra.mxu0 %vm115_vm0, %v33_v31  ;;  %519 = vmatpush.xpose.msk.msra.mxu1 %vm115_vm0, %v49_v32  ;;  %v410_v31 = vld [vmem:[%s796_s5] sm:$0x1] }
  0x34   :  { %307 = vxpose.xlu2.b32.cont [2/3] (short) (narrow) %v292_v42, 16 }
  0x35   :  { %501 = vmatpush.xpose.msk.msra.mxu0 %vm115_vm0, %v32_v33  ;;  %520 = vmatpush.xpose.msk.msra.mxu1 %vm115_vm0, %v48_v34 }
  0x39   :  { %502 = vmatpush.xpose.msk.msra.mxu0 %vm115_vm0, %v31_v35  ;;  %521 = vmatpush.xpose.msk.msra.mxu1 %vm115_vm0, %v47_v36  ;;  %v468_v36 = vlaneseq }
  0x3b   :  { %vm470_vm15 = vcmp.lt.s32.totalorder %v468_v36, 256 }
  0x3c   :  { %308 = vxpose.xlu2.b32.end [3/3] (short) (narrow) %v293_v44, 16 }
  0x3d   :  { %503 = vmatpush.xpose.msk.msra.mxu0 %vm115_vm0, %v30_v37  ;;  %522 = vmatpush.xpose.msk.msra.mxu1 %vm115_vm0, %v46_v38 }
  0x41   :  { %504 = vmatpush.xpose.msk.msra.mxu0 %vm115_vm0, %v29_v39  ;;  %523 = vmatpush.xpose.msk.msra.mxu1 %vm115_vm0, %v45_v40 }
  0x60   :  { %v71_v55 = vpop.permute.xlu2 %70 }
  0x80   :  { %v81_v51 = vpop.permute.xlu1 %80 }
  0x83   :  { %540 = vset.pattern.permute.xlu0 %v567_v4 }
  0x88   :  { %v76_v54 = vpop.permute.xlu1 %75 }
  0x8a   :  { %414 = vperm.xlu0 %540, %v411_v14  }
  0x90   :  { %v304_v15 = vpop.permute.xlu1 %303 }
  0x98   :  { %v299_v18 = vpop.permute.xlu1 %298 }
  0xa8   :  { %v99_v46 = vpop.trf.xlu0 }
  0xa9   :  { %505 = vmatmul.msk.f32.vlgmr.msra.gmra.mxu0 %vm115_vm0, %v99_v46  ;;  %524 = vmatmul.msk.f32.vlgmr.msra.gmra.mxu1 %vm115_vm0, %v99_v46 }
  0xb0   :  { %v100_v47 = vpop.trf.xlu0 }
  0xb1   :  { %506 = vmatmul.msk.f32.gmra.mxu0 %vm115_vm0, %v100_v47  ;;  %525 = vmatmul.msk.f32.gmra.mxu1 %vm115_vm0, %v100_v47 }
  0xb8   :  { %v101_v48 = vpop.trf.xlu0 }
  0xb9   :  { %507 = vmatmul.msk.f32.gmra.mxu0 %vm115_vm0, %v101_v48  ;;  %526 = vmatmul.msk.f32.gmra.mxu1 %vm115_vm0, %v101_v48 }
  0xc5   :  { %v322_v8 = vpop.trf.xlu2 }
  0xcd   :  { %v323_v13 = vpop.trf.xlu2 }
  0xfc   :  { %v415_v34 = vpop.permute.xlu0 %414 }
  0xfd   :  { %v417_v35 = vperm.slane %v415_v34, 0 }
 0x126   :  { %v238_v49 = vpop.f32.mrf.mxu0  ;;  %v264_v50 = vpop.f32.mrf.mxu1 }
 0x127   :  { %v239_v60 = vadd.f32 %v238_v49, %v71_v55  ;;  %v265_v61 = vadd.f32 %v264_v50, %v71_v55 }
 0x129   :  { %v279_v6 = vmul.f32 0.01, %v239_v60  ;;  %v280_v7 = vmul.f32 0.01, %v265_v61  ;;  %vm273_vm6 = vcmp.gt.f32.partialorder %v239_v60, 0.0  ;;  %vm274_vm7 = vcmp.gt.f32.partialorder %v265_v61, 0.0 }
 0x12b   :  { %v285_v11 = vsel %vm273_vm6, %v239_v60, %v279_v6  ;;  %v286_v12 = vsel %vm274_vm7, %v265_v61, %v280_v7 }
 0x12e   :  { %v241_v52 = vpop.f32.mrf.mxu0  ;;  %v267_v53 = vpop.f32.mrf.mxu1 }
 0x12f   :  { %v242_v56 = vadd.f32 %v241_v52, %v76_v54  ;;  %v268_v57 = vadd.f32 %v267_v53, %v76_v54 }
 0x131   :  { %v281_v0 = vmul.f32 0.01, %v242_v56  ;;  %v282_v1 = vmul.f32 0.01, %v268_v57  ;;  %vm275_vm4 = vcmp.gt.f32.partialorder %v242_v56, 0.0  ;;  %vm276_vm5 = vcmp.gt.f32.partialorder %v268_v57, 0.0 }
 0x133   :  { %v287_v9 = vsel %vm275_vm4, %v242_v56, %v281_v0  ;;  %v288_v10 = vsel %vm276_vm5, %v268_v57, %v282_v1 }
 0x136   :  { %v244_v58 = vpop.f32.mrf.mxu0  ;;  %v270_v59 = vpop.f32.mrf.mxu1 }
 0x137   :  { %v245_v62 = vadd.f32 %v244_v58, %v81_v51  ;;  %v271_v63 = vadd.f32 %v270_v59, %v81_v51 }
 0x139   :  { %vm277_vm2 = vcmp.gt.f32.partialorder %v245_v62, 0.0  ;;  %v283_v2 = vmul.f32 0.01, %v245_v62  ;;  %vm278_vm3 = vcmp.gt.f32.partialorder %v271_v63, 0.0  ;;  %v284_v3 = vmul.f32 0.01, %v271_v63 }
 0x13b   :  { %v289_v4 = vsel %vm277_vm2, %v245_v62, %v283_v2  ;;  %v290_v5 = vsel %vm278_vm3, %v271_v63, %v284_v3 }
 0x13c   :  { %527 = vmatpush.msk.msra.mxu2 %vm345_vm1, %v289_v4  ;;  %530 = vmatpush.msk.msra.mxu3 %vm345_vm1, %v290_v5 }
 0x13e   :  { %366 = vmatpush.msra.mxu2 %v287_v9  ;;  %389 = vmatpush.msra.mxu3 %v288_v10 }
 0x140   :  { %367 = vmatpush.msra.mxu2 %v285_v11  ;;  %390 = vmatpush.msra.mxu3 %v286_v12 }
 0x141   :  { %528 = vmatmul.msk.f32.vlgmr.msra.gmra.mxu2 %vm338_vm8, %v322_v8  ;;  %531 = vmatmul.msk.f32.vlgmr.msra.gmra.mxu3 %vm338_vm8, %v322_v8 }
 0x149   :  { %529 = vmatmul.msk.f32.gmra.mxu2 %vm338_vm8, %v323_v13  ;;  %532 = vmatmul.msk.f32.gmra.mxu3 %vm338_vm8, %v323_v13 }
 0x1c4   :  { %v369_v16 = vpop.f32.mrf.mxu2  ;;  %v392_v17 = vpop.f32.mrf.mxu3 }
 0x1c5   :  { %v370_v19 = vadd.f32 %v369_v16, %v299_v18  ;;  %v393_v20 = vadd.f32 %v392_v17, %v299_v18 }
 0x1c7   :  { %v402_v25 = vmul.f32 0.01, %v370_v19  ;;  %v403_v26 = vmul.f32 0.01, %v393_v20  ;;  %vm398_vm11 = vcmp.gt.f32.partialorder %v370_v19, 0.0  ;;  %vm399_vm12 = vcmp.gt.f32.partialorder %v393_v20, 0.0 }
 0x1c9   :  { %v406_v32 = vsel %vm398_vm11, %v370_v19, %v402_v25  ;;  %v407_v33 = vsel %vm399_vm12, %v393_v20, %v403_v26 }
 0x1cc   :  { %v372_v21 = vpop.f32.mrf.mxu2  ;;  %v395_v22 = vpop.f32.mrf.mxu3 }
 0x1cd   :  { %v373_v23 = vadd.f32 %v372_v21, %v304_v15  ;;  %v396_v24 = vadd.f32 %v395_v22, %v304_v15 }
 0x1cf   :  { %vm400_vm9 = vcmp.gt.f32.partialorder %v373_v23, 0.0  ;;  %v404_v27 = vmul.f32 0.01, %v373_v23  ;;  %vm401_vm10 = vcmp.gt.f32.partialorder %v396_v24, 0.0  ;;  %v405_v28 = vmul.f32 0.01, %v396_v24 }
 0x1d1   :  { %v408_v29 = vsel %vm400_vm9, %v373_v23, %v404_v27  ;;  %v409_v30 = vsel %vm401_vm10, %v396_v24, %v405_v28 }
 0x1d2   :  { %436 = vmatpush.msrb.mxu2 %v408_v29  ;;  %456 = vmatpush.msrb.mxu3 %v409_v30 }
 0x1d4   :  { %437 = vmatpush.msrb.mxu2 %v406_v32  ;;  %457 = vmatpush.msrb.mxu3 %v407_v33 }
 0x1d5   :  { %534 = vmatmul.msk.f32.vlgmr.msrb.gmra.mxu3 %vm418_vm13, %v410_v31  ;;  %533 = vmatmul.msk.f32.vlgmr.msrb.gmra.mxu2 %vm418_vm13, %v410_v31 }
 0x258   :  { %v459_v37 = vpop.f32.mrf.mxu3  ;;  %v439_v38 = vpop.f32.mrf.mxu2 }
 0x259   :  { %v460_v39 = vadd.f32 %v459_v37, %v417_v35  ;;  %v440_v41 = vadd.f32 %v439_v38, %v417_v35 }
 0x25b   :  { %v464_v40 = vrot.slane %v460_v39, 7 }
 0x25d   :  { %v466_v42 = vsel %vm465_vm14, %v440_v41, %v464_v40 }
 0x25e   :  { %472 = vst.msk [vmem:[#allocation3] sm:$0x3] %vm470_vm15, %v466_v42 }
 0x25f   :  { %483 = dma.vmem_to_hbm [thread:$0]  %s479_s15, 32, %s481_s1, [#allocation4]  }
 0x260   :  { %565 = dma.done.wait [#allocation4], 32  }
 0x261   :  { %566 = vsyncadd [#allocation4], 4294967264 }
 0x262   :  { %488 = vsyncpa [#allocation4], 1 }

</bundles_post_ra>
